<compile_context>
chip_gen: v7x
topology: tpu7x:2x2x1
jax: 0.10.0
libtpu: 0.0.40
codegen_flags: <defaults>
</compile_context>

<pallas_src>
import numpy as np
import jax
import jax.numpy as jnp
from jax.experimental import pallas as pl
from jax.experimental.pallas import tpu as pltpu

ENV_PARAMS = {'obs': 3, 'goal': 3, 'action': 3, 'action_max': 0.2}

S_DIM = ENV_PARAMS['obs'] + ENV_PARAMS['goal']      # 6
A_DIM = ENV_PARAMS['action']                        # 3
IN_DIM = S_DIM + A_DIM                              # 9
H1_DIM = 36
H2_DIM = 81
OUT_DIM = 1

_LANE = 128


def _round_up(x, m):
    return ((x + m - 1) // m) * m


def _cnet_kernel(s_ref, a_ref, w1s_ref, w1a_ref, b1_ref,
                 w2_ref, b2_ref, w3_ref, b3_ref, out_ref):
    """One batch tile; activations are [feat, TB] (batch on the lane axis)."""
    h1 = jnp.dot(w1s_ref[...], s_ref[...], preferred_element_type=jnp.float32)
    h1 = h1 + jnp.dot(w1a_ref[...], a_ref[...], preferred_element_type=jnp.float32)
    h1 = jnp.maximum(h1 + b1_ref[...], 0.0)                                 # [36, TB]
    h2 = jnp.dot(w2_ref[...], h1, preferred_element_type=jnp.float32)
    h2 = jnp.maximum(h2 + b2_ref[...], 0.0)                                 # [81, TB]
    q = jnp.dot(w3_ref[...], h2, preferred_element_type=jnp.float32)
    out_ref[...] = q + b3_ref[...]                                          # [1,  TB]


def cnet_forward(s, a, params, *, block_b=8192):
    """s: [B, 6] f32, a: [B, 3] f32 -> q: [B, 1] f32."""
    w1s, w1a, b1, w2, b2, w3, b3 = params
    B = s.shape[0]

    # NOTE: for tiny batches (B << 128) the pallas_call launch + DMA overhead
    # dominates and the fused-XLA path (cnet_reference) is faster; the kernel
    # pays off at large B where the batch-tiled pipeline amortizes it.

    # Feature-major layout: batch -> lane axis, padded to the tile size.
    tb = min(_round_up(block_b, _LANE), _round_up(B, _LANE))
    b_pad = _round_up(B, tb)
    pad = b_pad - B
    s_t = jnp.pad(s.T.astype(jnp.float32), ((0, 0), (0, pad)))              # [6, Bp]
    a_t = jnp.pad(a.T.astype(jnp.float32), ((0, 0), (0, pad)))              # [3, Bp]

    grid = (b_pad // tb,)

    def const(shape):   # weights / biases: same block every step -> VMEM-resident
        return pl.BlockSpec(shape, lambda i: (0, 0))

    flops = 2 * b_pad * (IN_DIM * H1_DIM + H1_DIM * H2_DIM + H2_DIM * OUT_DIM)
    w_bytes = 4 * (H1_DIM * (IN_DIM + 1) + H2_DIM * (H1_DIM + 1) + OUT_DIM * (H2_DIM + 1))
    cost = pl.CostEstimate(
        flops=flops,
        transcendentals=0,
        bytes_accessed=4 * b_pad * (IN_DIM + OUT_DIM) + w_bytes,
    )

    q_t = pl.pallas_call(
        _cnet_kernel,
        grid=grid,
        in_specs=[
            pl.BlockSpec((S_DIM, tb), lambda i: (0, i)),      # s tile, lane-dense
            pl.BlockSpec((A_DIM, tb), lambda i: (0, i)),      # a tile, lane-dense
            const((H1_DIM, S_DIM)), const((H1_DIM, A_DIM)), const((H1_DIM, 1)),
            const((H2_DIM, H1_DIM)), const((H2_DIM, 1)),
            const((OUT_DIM, H2_DIM)), const((OUT_DIM, 1)),
        ],
        out_specs=pl.BlockSpec((OUT_DIM, tb), lambda i: (0, i)),
        out_shape=jax.ShapeDtypeStruct((OUT_DIM, b_pad), jnp.float32),
        compiler_params=pltpu.CompilerParams(
            dimension_semantics=("parallel",)),               # v7x: split batch over 2 TCs
        cost_estimate=cost,
    )(s_t, a_t, w1s, w1a, b1, w2, b2, w3, b3)

    return q_t[:, :B].T                                                     # [B, 1]


def init_cnet_params(key):
    """PyTorch nn.Linear default init: U(-1/sqrt(fan_in), 1/sqrt(fan_in)).
    Weights in PyTorch's [out, in] orientation (W1 split into s/a parts);
    biases as [out, 1] so they broadcast along the lane (batch) axis."""
    k1w, k1b, k2w, k2b, k3w, k3b = jax.random.split(key, 6)
    bd1 = 1.0 / np.sqrt(IN_DIM)
    w1 = jax.random.uniform(k1w, (H1_DIM, IN_DIM), jnp.float32, -bd1, bd1)
    b1 = jax.random.uniform(k1b, (H1_DIM, 1), jnp.float32, -bd1, bd1)
    bd2 = 1.0 / np.sqrt(H1_DIM)
    w2 = jax.random.uniform(k2w, (H2_DIM, H1_DIM), jnp.float32, -bd2, bd2)
    b2 = jax.random.uniform(k2b, (H2_DIM, 1), jnp.float32, -bd2, bd2)
    bd3 = 1.0 / np.sqrt(H2_DIM)
    w3 = jax.random.uniform(k3w, (OUT_DIM, H2_DIM), jnp.float32, -bd3, bd3)
    b3 = jax.random.uniform(k3b, (OUT_DIM, 1), jnp.float32, -bd3, bd3)
    w1s, w1a = w1[:, :S_DIM], w1[:, S_DIM:]
    return (w1s, w1a, b1, w2, b2, w3, b3)


def cnet_reference(s, a, params):
    """Pure-JAX reference of the forward pass for a correctness check."""
    w1s, w1a, b1, w2, b2, w3, b3 = params
    x = jnp.concatenate((s, a), axis=1)                                      # [B, 9]
    w1 = jnp.concatenate((w1s, w1a), axis=1)                                 # [36, 9]
    h1 = jnp.maximum(x @ w1.T + b1[:, 0], 0.0)
    h2 = jnp.maximum(h1 @ w2.T + b2[:, 0], 0.0)
    return h2 @ w3.T + b3[:, 0]


if __name__ == "__main__":
    key = jax.random.PRNGKey(0)
    kp, ks, ka = jax.random.split(key, 3)

    params = init_cnet_params(kp)

    B = 8  # small demo batch (padded to one 128-lane tile inside the wrapper)
    s = jax.random.normal(ks, (B, S_DIM), jnp.float32)
    a = jax.random.normal(ka, (B, A_DIM), jnp.float32)

    q = jax.block_until_ready(cnet_forward(s, a, params))
    q_ref = jax.block_until_ready(cnet_reference(s, a, params))

    assert q.shape == (B, OUT_DIM)
    np.testing.assert_allclose(np.asarray(q), np.asarray(q_ref), rtol=1e-5, atol=1e-5)

    print("KERNEL_OK")
</pallas_src>

<mosaic_0001>
module attributes {stable_mosaic.version = 11 : i64} {
  func.func @_cnet_kernel(%arg0: i32, %arg1: memref<6x128xf32, #tpu.memory_space<vmem>>, %arg2: memref<3x128xf32, #tpu.memory_space<vmem>>, %arg3: memref<36x6xf32, #tpu.memory_space<vmem>>, %arg4: memref<36x3xf32, #tpu.memory_space<vmem>>, %arg5: memref<36x1xf32, #tpu.memory_space<vmem>>, %arg6: memref<81x36xf32, #tpu.memory_space<vmem>>, %arg7: memref<81x1xf32, #tpu.memory_space<vmem>>, %arg8: memref<1x81xf32, #tpu.memory_space<vmem>>, %arg9: memref<1x1xf32, #tpu.memory_space<vmem>>, %arg10: memref<1x128xf32, #tpu.memory_space<vmem>>) attributes {dimension_semantics = [#tpu.dimension_semantics<parallel>], iteration_bounds = array<i64: 1>, scalar_prefetch = 0 : i64, scratch_operands = 0 : i64, tpu.core_type = #tpu.core_type<tc>, window_params = [{transform_indices = @transform_0, window_bounds = array<i64: 6, 128>}, {transform_indices = @transform_1, window_bounds = array<i64: 3, 128>}, {pipeline_mode = #tpu.pipeline_mode<synchronous>, transform_indices = @transform_2, window_bounds = array<i64: 36, 6>}, {pipeline_mode = #tpu.pipeline_mode<synchronous>, transform_indices = @transform_3, window_bounds = array<i64: 36, 3>}, {pipeline_mode = #tpu.pipeline_mode<synchronous>, transform_indices = @transform_4, window_bounds = array<i64: 36, 1>}, {pipeline_mode = #tpu.pipeline_mode<synchronous>, transform_indices = @transform_5, window_bounds = array<i64: 81, 36>}, {pipeline_mode = #tpu.pipeline_mode<synchronous>, transform_indices = @transform_6, window_bounds = array<i64: 81, 1>}, {pipeline_mode = #tpu.pipeline_mode<synchronous>, transform_indices = @transform_7, window_bounds = array<i64: 1, 81>}, {pipeline_mode = #tpu.pipeline_mode<synchronous>, transform_indices = @transform_8, window_bounds = array<i64: 1, 1>}, {transform_indices = @transform_9, window_bounds = array<i64: 1, 128>}]} {
    %c0 = arith.constant 0 : index
    %c0_0 = arith.constant 0 : index
    %0 = vector.load %arg3[%c0, %c0_0] : memref<36x6xf32, #tpu.memory_space<vmem>>, vector<36x6xf32>
    %c0_1 = arith.constant 0 : index
    %c0_2 = arith.constant 0 : index
    %1 = vector.load %arg1[%c0_1, %c0_2] : memref<6x128xf32, #tpu.memory_space<vmem>>, vector<6x128xf32>
    %cst = arith.constant dense<0.000000e+00> : vector<36x128xf32>
    %2 = tpu.matmul %0, %1, %cst {dimension_numbers = #tpu.dot_dimension_numbers<[1], [0], [0], [1], [0, 0, 1, 1], [], []>} : vector<36x6xf32>, vector<6x128xf32>, vector<36x128xf32> -> vector<36x128xf32>
    %c0_3 = arith.constant 0 : index
    %c0_4 = arith.constant 0 : index
    %3 = vector.load %arg4[%c0_3, %c0_4] : memref<36x3xf32, #tpu.memory_space<vmem>>, vector<36x3xf32>
    %c0_5 = arith.constant 0 : index
    %c0_6 = arith.constant 0 : index
    %4 = vector.load %arg2[%c0_5, %c0_6] : memref<3x128xf32, #tpu.memory_space<vmem>>, vector<3x128xf32>
    %cst_7 = arith.constant dense<0.000000e+00> : vector<36x128xf32>
    %5 = tpu.matmul %3, %4, %cst_7 {dimension_numbers = #tpu.dot_dimension_numbers<[1], [0], [0], [1], [0, 0, 1, 1], [], []>} : vector<36x3xf32>, vector<3x128xf32>, vector<36x128xf32> -> vector<36x128xf32>
    %6 = arith.addf %2, %5 : vector<36x128xf32>
    %c0_8 = arith.constant 0 : index
    %c0_9 = arith.constant 0 : index
    %7 = vector.load %arg5[%c0_8, %c0_9] : memref<36x1xf32, #tpu.memory_space<vmem>>, vector<36x1xf32>
    %8 = vector.broadcast %7 : vector<36x1xf32> to vector<36x128xf32>
    %9 = arith.addf %6, %8 : vector<36x128xf32>
    %cst_10 = arith.constant 0.000000e+00 : f32
    %10 = vector.broadcast %cst_10 : f32 to vector<36x128xf32>
    %11 = arith.maximumf %9, %10 : vector<36x128xf32>
    %c0_11 = arith.constant 0 : index
    %c0_12 = arith.constant 0 : index
    %12 = vector.load %arg6[%c0_11, %c0_12] : memref<81x36xf32, #tpu.memory_space<vmem>>, vector<81x36xf32>
    %cst_13 = arith.constant dense<0.000000e+00> : vector<81x128xf32>
    %13 = tpu.matmul %12, %11, %cst_13 {dimension_numbers = #tpu.dot_dimension_numbers<[1], [0], [0], [1], [0, 0, 1, 1], [], []>} : vector<81x36xf32>, vector<36x128xf32>, vector<81x128xf32> -> vector<81x128xf32>
    %c0_14 = arith.constant 0 : index
    %c0_15 = arith.constant 0 : index
    %14 = vector.load %arg7[%c0_14, %c0_15] : memref<81x1xf32, #tpu.memory_space<vmem>>, vector<81x1xf32>
    %15 = vector.broadcast %14 : vector<81x1xf32> to vector<81x128xf32>
    %16 = arith.addf %13, %15 : vector<81x128xf32>
    %cst_16 = arith.constant 0.000000e+00 : f32
    %17 = vector.broadcast %cst_16 : f32 to vector<81x128xf32>
    %18 = arith.maximumf %16, %17 : vector<81x128xf32>
    %c0_17 = arith.constant 0 : index
    %c0_18 = arith.constant 0 : index
    %19 = vector.load %arg8[%c0_17, %c0_18] : memref<1x81xf32, #tpu.memory_space<vmem>>, vector<1x81xf32>
    %cst_19 = arith.constant dense<0.000000e+00> : vector<1x128xf32>
    %20 = tpu.matmul %19, %18, %cst_19 {dimension_numbers = #tpu.dot_dimension_numbers<[1], [0], [0], [1], [0, 0, 1, 1], [], []>} : vector<1x81xf32>, vector<81x128xf32>, vector<1x128xf32> -> vector<1x128xf32>
    %c0_20 = arith.constant 0 : index
    %c0_21 = arith.constant 0 : index
    %21 = vector.load %arg9[%c0_20, %c0_21] : memref<1x1xf32, #tpu.memory_space<vmem>>, vector<1x1xf32>
    %22 = vector.broadcast %21 : vector<1x1xf32> to vector<1x128xf32>
    %23 = arith.addf %20, %22 : vector<1x128xf32>
    %c0_22 = arith.constant 0 : index
    %c0_23 = arith.constant 0 : index
    %24 = vector.load %arg10[%c0_22, %c0_23] : memref<1x128xf32, #tpu.memory_space<vmem>>, vector<1x128xf32>
    tpu.vector_store %arg10[%c0_22, %c0_23], %23 {strides = array<i32>} : memref<1x128xf32, #tpu.memory_space<vmem>>, vector<1x128xf32>,
    return
  }
  func.func @transform_0(%arg0: i32) -> (i32, i32) {
    %c0_i32 = arith.constant 0 : i32
    %c0_i32_0 = arith.constant 0 : i32
    return %c0_i32, %arg0 : i32, i32
  }
  func.func @transform_1(%arg0: i32) -> (i32, i32) {
    %c0_i32 = arith.constant 0 : i32
    %c0_i32_0 = arith.constant 0 : i32
    return %c0_i32, %arg0 : i32, i32
  }
  func.func @transform_2(%arg0: i32) -> (i32, i32) {
    %c0_i32 = arith.constant 0 : i32
    %c0_i32_0 = arith.constant 0 : i32
    %c0_i32_1 = arith.constant 0 : i32
    return %c0_i32, %c0_i32_0 : i32, i32
  }
  func.func @transform_3(%arg0: i32) -> (i32, i32) {
    %c0_i32 = arith.constant 0 : i32
    %c0_i32_0 = arith.constant 0 : i32
    %c0_i32_1 = arith.constant 0 : i32
    return %c0_i32, %c0_i32_0 : i32, i32
  }
  func.func @transform_4(%arg0: i32) -> (i32, i32) {
    %c0_i32 = arith.constant 0 : i32
    %c0_i32_0 = arith.constant 0 : i32
    %c0_i32_1 = arith.constant 0 : i32
    return %c0_i32, %c0_i32_0 : i32, i32
  }
  func.func @transform_5(%arg0: i32) -> (i32, i32) {
    %c0_i32 = arith.constant 0 : i32
    %c0_i32_0 = arith.constant 0 : i32
    %c0_i32_1 = arith.constant 0 : i32
    return %c0_i32, %c0_i32_0 : i32, i32
  }
  func.func @transform_6(%arg0: i32) -> (i32, i32) {
    %c0_i32 = arith.constant 0 : i32
    %c0_i32_0 = arith.constant 0 : i32
    %c0_i32_1 = arith.constant 0 : i32
    return %c0_i32, %c0_i32_0 : i32, i32
  }
  func.func @transform_7(%arg0: i32) -> (i32, i32) {
    %c0_i32 = arith.constant 0 : i32
    %c0_i32_0 = arith.constant 0 : i32
    %c0_i32_1 = arith.constant 0 : i32
    return %c0_i32, %c0_i32_0 : i32, i32
  }
  func.func @transform_8(%arg0: i32) -> (i32, i32) {
    %c0_i32 = arith.constant 0 : i32
    %c0_i32_0 = arith.constant 0 : i32
    %c0_i32_1 = arith.constant 0 : i32
    return %c0_i32, %c0_i32_0 : i32, i32
  }
  func.func @transform_9(%arg0: i32) -> (i32, i32) {
    %c0_i32 = arith.constant 0 : i32
    %c0_i32_0 = arith.constant 0 : i32
    return %c0_i32, %arg0 : i32, i32
  }
}

</mosaic_0001>

<bundles_post_ra>
// kernel: tpu_custom_call.1
= control target key start
LH: loop header
LB: loop body
LE: loop exit
PB: predicated region body
PF: predicated region fallthrough
CT: control target
= control target key end

     0   :  { %s1143_s0 = inlined_call_operand.vmem [shape: f32[6,128], index: 0, kind: input, shape index: {}]   ;;  %s1144_s1 = inlined_call_operand.vmem [shape: f32[3,128], index: 1, kind: input, shape index: {}]   ;;  %s1145_s2 = inlined_call_operand.vmem [shape: f32[36,6], index: 2, kind: input, shape index: {}]   ;;  %s1146_s3 = inlined_call_operand.vmem [shape: f32[36,3], index: 3, kind: input, shape index: {}]   ;;  %s1147_s4 = inlined_call_operand.vmem [shape: f32[36,1], index: 4, kind: input, shape index: {}]   ;;  %s1148_s5 = inlined_call_operand.vmem [shape: f32[81,36], index: 5, kind: input, shape index: {}]   ;;  %s1149_s6 = inlined_call_operand.vmem [shape: f32[81,1], index: 6, kind: input, shape index: {}]   ;;  %s1150_s7 = inlined_call_operand.vmem [shape: f32[1,81], index: 7, kind: input, shape index: {}]   ;;  %s1151_s8 = inlined_call_operand.<no memory space> [shape: f32[1,1], index: 8, kind: input, shape index: {}]   ;;  %s1152_s9 = inlined_call_operand.hbm [shape: f32[1,128], index: 9, kind: output, shape index: {}]  }
   0x1   :  { %v14_v0 = vstv %s1151_s8 }
   0x2   :  { %15 = vst [vmem:[#allocation2] sm:$0x1] %v14_v0 }
   0x3   :  { %v46_v1 = vld [vmem:[%s1144_s1] sm:$0x7]  ;;  %vm63_vm0 = vcmask 1042432   ;;  %v877_v3 = vmov 0.0   ;;  %vm878_vm1 = vmmov 0   ;;  %vm47_vm2 = vcmask 23552  }
   0x4   :  { %v41_v2 = vld [vmem:[%s1146_s3] sm:$0xff]  ;;  %723 = vmatprep.subr.mxu1 %v877_v3  ;;  %725 = vmatprep.mubr.msk.f32.mxu1 %vm878_vm1, %v877_v3  ;;  %vm173_vm3 = vcmask 1045504   ;;  %v42_v5 = vld [vmem:[%s1146_s3 + $0x8] sm:$0xff]  ;;  %v879_v7 = vmov 0   ;;  %v269_v8 = vld [vmem:[%s1147_s4 + $0x10] sm:$0xff] }
   0x5   :  { %v40_v4 = vld [vmem:[%s1143_s0] sm:$0x3f]  ;;  %724 = vmatpush3.msk.msra.mxu1 %vm63_vm0, %v46_v1  ;;  %767 = vmatprep.mubr.msk.f32.mxu0 %vm878_vm1, %v877_v3  ;;  %v268_v9 = vld [vmem:[%s1147_s4 + $0x8] sm:$0xff]  ;;  %v270_v10 = vld [vmem:[%s1147_s4 + $0x18] sm:$0xff] }
   0x6   :  { %726 = vmatmul.mubr.msk.f32.vlgmr.msra.gmra.mrb[0].mxu1 %vm47_vm2, %v41_v2  ;;  %740 = vmatprep.subr.mxu1 %v877_v3  ;;  %v267_v6 = vld [vmem:[%s1147_s4] sm:$0xff]  ;;  %v43_v11 = vld [vmem:[%s1146_s3 + $0x10] sm:$0xff] }
   0x7   :  { %741 = vmatpush3.msk.msra.mxu1 %vm173_vm3, %v40_v4  ;;  %728 = vmatprep.mubr.msk.f32.mxu1 %vm878_vm1, %v877_v3 }
   0x8   :  { %851 = vset.pattern.permute.xlu0 %v879_v7  ;;  %852 = vset.pattern.permute.xlu1 %v879_v7 }
   0x9   :  { %274 = vperm.xlu0 %851, %v267_v6   ;;  %284 = vperm.xlu1 %852, %v269_v8  }
   0xa   :  { %729 = vmatmul.mubr.msk.f32.gmra.mrb[2].mxu1 %vm47_vm2, %v42_v5 }
   0xb   :  { %731 = vmatprep.mubr.msk.f32.mxu1 %vm878_vm1, %v877_v3 }
   0xd   :  { %279 = vperm.xlu0 %851, %v268_v9   ;;  %289 = vperm.xlu1 %852, %v270_v10  }
   0xe   :  { %16 = vsyncpa [#allocation4], 0  ;;  %732 = vmatmul.mubr.msk.f32.gmra.mrb[4].mxu1 %vm47_vm2, %v43_v11  ;;  %v271_v12 = vld [vmem:[%s1147_s4 + $0x20] sm:$0xf]  ;;  %v44_v14 = vld [vmem:[%s1146_s3 + $0x18] sm:$0xff]  ;;  %vm157_vm4 = vcmask 48128  }
   0xf   :  { %v318_v13 = vld [vmem:[%s1149_s6] sm:$0xff]  ;;  %734 = vmatprep.mubr.msk.f32.mxu1 %vm878_vm1, %v877_v3  ;;  %v319_v15 = vld [vmem:[%s1149_s6 + $0x8] sm:$0xff]  ;;  %v320_v16 = vld [vmem:[%s1149_s6 + $0x10] sm:$0xff]  ;;  %v880_v32 = vmov 0.0|0.0   ;;  %vm418_vm5 = vcmask 1043456   ;;  %vm384_vm6 = vcmask 293888  }
  0x10   :  { %v45_v17 = vld [vmem:[%s1146_s3 + $0x20] sm:$0xf]  ;;  %v321_v18 = vld [vmem:[%s1149_s6 + $0x18] sm:$0xff]  ;;  %v323_v21 = vld [vmem:[%s1149_s6 + $0x28] sm:$0xff]  ;;  %825 = vmatprep.subr.bf16.mxu0 %v880_v32  ;;  %831 = vmatprep.subr.bf16.mxu1 %v880_v32  ;;  %vm568_vm7 = vcmask 1040384   ;;  %vm564_vm8 = vcmask 662528  }
  0x11   :  { %294 = vperm.xlu0 %851, %v271_v12   ;;  %331 = vperm.xlu1 %852, %v318_v13   ;;  %v322_v19 = vld [vmem:[%s1149_s6 + $0x20] sm:$0xff]  ;;  %v324_v22 = vld [vmem:[%s1149_s6 + $0x30] sm:$0xff]  ;;  %v36_v23 = vld [vmem:[%s1145_s2 + $0x8] sm:$0xff]  ;;  %s881_s12 = smov [#allocation3]  }
  0x12   :  { %735 = vmatmul.mubr.msk.f32.gmra.mrb[6].mxu1 %vm47_vm2, %v44_v14  ;;  %v35_v20 = vld [vmem:[%s1145_s2] sm:$0xff]  ;;  %v325_v24 = vld [vmem:[%s1149_s6 + $0x38] sm:$0xff]  ;;  %v37_v26 = vld [vmem:[%s1145_s2 + $0x10] sm:$0xff]  ;;  %s649_s4 = sshll.u32 %s881_s12, 4  ;;  %s650_s4 = int_to_ptr.vmem [resolvable:$true] %s649_s4 }
  0x13   :  { %737 = vmatprep.mubr.msk.f32.mxu1 %vm878_vm1, %v877_v3  ;;  %v326_v25 = vld [vmem:[%s1149_s6 + $0x40] sm:$0xff]  ;;  %v327_v27 = vld [vmem:[%s1149_s6 + $0x48] sm:$0xff]  ;;  %v328_v28 = vld [vmem:[%s1149_s6 + $0x50] sm:$0x1]  ;;  %s853_s13 = scalar_lea.vmem %s650_s4, 16  ;;  %s857_s14 = scalar_lea.vmem %s650_s4, 32 }
  0x14   :  { %v38_v29 = vld [vmem:[%s1145_s2 + $0x18] sm:$0xff]  ;;  %v554_v30 = vld [vmem:[#allocation2] sm:$0x1]  ;;  %v308_v13 = vld [vmem:[%s1148_s5 + $0x8] sm:$0xff]  ;;  %p854_p0 = scmp.ne.s32.totalorder %s650_s4, %s853_s13  ;;  %p858_p1 = scmp.lt.s32.totalorder %s650_s4, %s650_s4 }
  0x15   :  { %336 = vperm.xlu0 %851, %v319_v15   ;;  %341 = vperm.xlu1 %852, %v320_v16   ;;  %v39_v31 = vld [vmem:[%s1145_s2 + $0x20] sm:$0xf]  ;;  %v309_v14 = vld [vmem:[%s1148_s5 + $0x10] sm:$0xff]  ;;  %v310_v15 = vld [vmem:[%s1148_s5 + $0x18] sm:$0xff]  ;;  %p859_p2 = scmp.lt.s32.totalorder %s857_s14, %s853_s13 }
  0x16   :  { %738 = vmatmul.mubr.msk.f32.gmra.mrb[8].mxu1 %vm47_vm2, %v45_v17  ;;  %v307_v12 = vld [vmem:[%s1148_s5] sm:$0xff]  ;;  %v312_v17 = vld [vmem:[%s1148_s5 + $0x28] sm:$0xff] }
  0x17   :  { %742 = vmatprep.mubr.msk.f32.mxu1 %vm878_vm1, %v877_v3  ;;  %v311_v16 = vld [vmem:[%s1148_s5 + $0x20] sm:$0xff]  ;;  %p860_p3 = por %p859_p2, %p858_p1 }
  0x19   :  { %346 = vperm.xlu0 %851, %v321_v18   ;;  %351 = vperm.xlu1 %852, %v322_v19   ;;  %v313_v18 = vld [vmem:[%s1148_s5 + $0x30] sm:$0xff]  ;;  %v314_v19 = vld [vmem:[%s1148_s5 + $0x38] sm:$0xff]  ;;  %p861_p4 = pnand %p860_p3, %p854_p0 }
  0x1a   :  { %743 = vmatmul.mubr.msk.f32.vlgmr.msra.gmra.mrb[10].mxu1 %vm157_vm4, %v35_v20  ;;  %v315_v20 = vld [vmem:[%s1148_s5 + $0x40] sm:$0xff] }
  0x1b   :  { %745 = vmatprep.mubr.msk.f32.mxu1 %vm878_vm1, %v877_v3 }
  0x1d   :  { %356 = vperm.xlu0 %851, %v323_v21   ;;  %361 = vperm.xlu1 %852, %v324_v22   ;;  %v316_v21 = vld [vmem:[%s1148_s5 + $0x48] sm:$0xff]  ;;  %v317_v22 = vld [vmem:[%s1148_s5 + $0x50] sm:$0x1] }
  0x1e   :  { %746 = vmatmul.mubr.msk.f32.gmra.mrb[12].mxu1 %vm157_vm4, %v36_v23 }
  0x1f   :  { %748 = vmatprep.mubr.msk.f32.mxu1 %vm878_vm1, %v877_v3 }
  0x21   :  { %366 = vperm.xlu0 %851, %v325_v24   ;;  %371 = vperm.xlu1 %852, %v326_v25  }
  0x22   :  { %749 = vmatmul.mubr.msk.f32.gmra.mrb[14].mxu1 %vm157_vm4, %v37_v26 }
  0x23   :  { %751 = vmatprep.mubr.msk.f32.mxu1 %vm878_vm1, %v877_v3 }
  0x25   :  { %376 = vperm.xlu0 %851, %v327_v27   ;;  %381 = vperm.xlu1 %852, %v328_v28  }
  0x26   :  { %752 = vmatmul.mubr.msk.f32.gmra.mrb[16].mxu1 %vm157_vm4, %v38_v29 }
  0x27   :  { %754 = vmatprep.mubr.msk.f32.mxu1 %vm878_vm1, %v877_v3 }
  0x29   :  { %557 = vperm.xlu0 %851, %v554_v30  }
  0x2a   :  { %755 = vmatmul.mubr.msk.f32.gmra.mrb[18].mxu1 %vm157_vm4, %v39_v31 }
  0x2b   :  { %822 = vmatprep.mubr.msk.f32.mxu1 %vm878_vm1, %v877_v3 }
  0x88   :  { %v275_v43 = vpop.permute.xlu0 %274  ;;  %v285_v53 = vpop.permute.xlu1 %284 }
  0x8c   :  { %v280_v51 = vpop.permute.xlu0 %279  ;;  %v290_v0 = vpop.permute.xlu1 %289 }
  0x90   :  { %v295_v8 = vpop.permute.xlu0 %294  ;;  %v332_v25 = vpop.permute.xlu1 %331 }
  0x94   :  { %v337_v27 = vpop.permute.xlu0 %336 }
  0xd9   :  { %v133_v33 = vpop.f32.mrb[0].mxu1 }
  0xda   :  { %v727_v34 = vpop.f32.mrb[1].mxu1 }
  0xdd   :  { %v138_v35 = vpop.f32.mrb[2].mxu1 }
  0xde   :  { %v730_v36 = vpop.f32.mrb[3].mxu1 }
  0xe1   :  { %v143_v37 = vpop.f32.mrb[4].mxu1 }
  0xe2   :  { %v733_v38 = vpop.f32.mrb[5].mxu1 }
  0xe5   :  { %v148_v39 = vpop.f32.mrb[6].mxu1 }
  0xe6   :  { %v736_v40 = vpop.f32.mrb[7].mxu1 }
  0xe9   :  { %v153_v41 = vpop.f32.mrb[8].mxu1 }
  0xea   :  { %v739_v42 = vpop.f32.mrb[9].mxu1 }
  0xed   :  { %v243_v44 = vpop.f32.mrb[10].mxu1 }
  0xee   :  { %v244_v45 = vadd.f32 %v243_v44, %v133_v33  ;;  %v744_v46 = vpop.f32.mrb[11].mxu1 }
  0xf0   :  { %v297_v48 = vadd.f32 %v275_v43, %v244_v45 }
  0xf1   :  { %v248_v47 = vpop.f32.mrb[12].mxu1 }
  0xf2   :  { %v249_v49 = vadd.f32 %v248_v47, %v138_v35  ;;  %v747_v50 = vpop.f32.mrb[13].mxu1  ;;  %v302_v55 = vmax.f32 %v297_v48, 0.0 }
  0xf4   :  { %v298_v52 = vadd.f32 %v280_v51, %v249_v49 }
  0xf5   :  { %v253_v54 = vpop.f32.mrb[14].mxu1 }
  0xf6   :  { %v303_v56 = vmax.f32 %v298_v52, 0.0  ;;  %v254_v57 = vadd.f32 %v253_v54, %v143_v37  ;;  %v750_v58 = vpop.f32.mrb[15].mxu1  ;;  %v342_v37 = vpop.permute.xlu1 %341 }
  0xf8   :  { %v826_v59 = vpack.c.bf16 %v303_v56, %v302_v55  ;;  %v299_v61 = vadd.f32 %v285_v53, %v254_v57 }
  0xf9   :  { %v258_v60 = vpop.f32.mrb[16].mxu1 }
  0xfa   :  { %v259_v62 = vadd.f32 %v258_v60, %v148_v39  ;;  %v753_v63 = vpop.f32.mrb[17].mxu1  ;;  %827 = vmatpush3.bf16.msra.mxu0 %v826_v59  ;;  %v304_v4 = vmax.f32 %v299_v61, 0.0  ;;  %v347_v39 = vpop.permute.xlu0 %346 }
  0xfb   :  { %828 = vmatprep.subr.bf16.mxu0 %v880_v32  ;;  %v352_v48 = vpop.permute.xlu1 %351 }
  0xfc   :  { %v300_v1 = vadd.f32 %v290_v0, %v259_v62 }
  0xfd   :  { %v263_v2 = vpop.f32.mrb[18].mxu1 }
  0xfe   :  { %v305_v5 = vmax.f32 %v300_v1, 0.0  ;;  %v264_v6 = vadd.f32 %v263_v2, %v153_v41  ;;  %v756_v7 = vpop.f32.mrb[19].mxu1  ;;  %v357_v50 = vpop.permute.xlu0 %356 }
  0xff   :  { %v362_v59 = vpop.permute.xlu1 %361 }
 0x100   :  { %v301_v9 = vadd.f32 %v295_v8, %v264_v6  ;;  %v829_v10 = vpack.c.bf16 %v305_v5, %v304_v4 }
 0x102   :  { %830 = vmatpush3.bf16.msra.mxu0 %v829_v10  ;;  %v306_v11 = vmax.f32 %v301_v9, 0.0  ;;  %v367_v61 = vpop.permute.xlu0 %366 }
 0x103   :  { %765 = vmatprep.subr.mxu0 %v877_v3  ;;  %v372_v7 = vpop.permute.xlu1 %371 }
 0x106   :  { %766 = vmatpush3.msk.msra.mxu0 %vm418_vm5, %v306_v11  ;;  %v377_v9 = vpop.permute.xlu0 %376 }
 0x107   :  { %768 = vmatmul.mubr.msk.f32.vlgmr.msra.gmra.mrb[0].mxu0 %vm384_vm6, %v307_v12 }
 0x108   :  { %770 = vmatprep.mubr.msk.f32.mxu0 %vm878_vm1, %v877_v3 }
 0x10b   :  { %771 = vmatmul.mubr.msk.f32.gmra.mrb[2].mxu0 %vm384_vm6, %v308_v13 }
 0x10c   :  { %773 = vmatprep.mubr.msk.f32.mxu0 %vm878_vm1, %v877_v3 }
 0x10f   :  { %774 = vmatmul.mubr.msk.f32.gmra.mrb[4].mxu0 %vm384_vm6, %v309_v14 }
 0x110   :  { %776 = vmatprep.mubr.msk.f32.mxu0 %vm878_vm1, %v877_v3 }
 0x113   :  { %777 = vmatmul.mubr.msk.f32.gmra.mrb[6].mxu0 %vm384_vm6, %v310_v15  ;;  %v382_v15 = vpop.permute.xlu1 %381 }
 0x114   :  { %779 = vmatprep.mubr.msk.f32.mxu0 %vm878_vm1, %v877_v3 }
 0x117   :  { %780 = vmatmul.mubr.msk.f32.gmra.mrb[8].mxu0 %vm384_vm6, %v311_v16 }
 0x118   :  { %782 = vmatprep.mubr.msk.f32.mxu0 %vm878_vm1, %v877_v3 }
 0x11b   :  { %783 = vmatmul.mubr.msk.f32.gmra.mrb[10].mxu0 %vm384_vm6, %v312_v17 }
 0x11c   :  { %785 = vmatprep.mubr.msk.f32.mxu0 %vm878_vm1, %v877_v3 }
 0x11f   :  { %786 = vmatmul.mubr.msk.f32.gmra.mrb[12].mxu0 %vm384_vm6, %v313_v18 }
 0x120   :  { %788 = vmatprep.mubr.msk.f32.mxu0 %vm878_vm1, %v877_v3 }
 0x123   :  { %789 = vmatmul.mubr.msk.f32.gmra.mrb[14].mxu0 %vm384_vm6, %v314_v19 }
 0x124   :  { %791 = vmatprep.mubr.msk.f32.mxu0 %vm878_vm1, %v877_v3 }
 0x127   :  { %792 = vmatmul.mubr.msk.f32.gmra.mrb[16].mxu0 %vm384_vm6, %v315_v20 }
 0x128   :  { %794 = vmatprep.mubr.msk.f32.mxu0 %vm878_vm1, %v877_v3 }
 0x12b   :  { %795 = vmatmul.mubr.msk.f32.gmra.mrb[18].mxu0 %vm384_vm6, %v316_v21  ;;  %v553_v21 = vld [vmem:[%s1150_s7] sm:$0x1] }
 0x12c   :  { %797 = vmatprep.mubr.msk.f32.mxu0 %vm878_vm1, %v877_v3 }
 0x12f   :  { %798 = vmatmul.mubr.msk.f32.gmra.mrb[20].mxu0 %vm384_vm6, %v317_v22 }
 0x1da   :  { %v488_v23 = vpop.f32.mrb[0].mxu0 }
 0x1db   :  { %v769_v24 = vpop.f32.mrb[1].mxu0  ;;  %v489_v26 = vadd.f32 %v488_v23, %v332_v25 }
 0x1dc   :  { %v558_v24 = vpop.permute.xlu0 %557 }
 0x1dd   :  { %v542_v31 = vmax.f32 %v489_v26, 0.0 }
 0x1de   :  { %v493_v28 = vpop.f32.mrb[2].mxu0 }
 0x1df   :  { %v494_v29 = vadd.f32 %v493_v28, %v337_v27  ;;  %v772_v30 = vpop.f32.mrb[3].mxu0 }
 0x1e1   :  { %v543_v33 = vmax.f32 %v494_v29, 0.0 }
 0x1e2   :  { %v498_v34 = vpop.f32.mrb[4].mxu0 }
 0x1e3   :  { %v832_v35 = vpack.c.bf16 %v543_v33, %v542_v31  ;;  %v775_v36 = vpop.f32.mrb[5].mxu0  ;;  %v499_v38 = vadd.f32 %v498_v34, %v342_v37 }
 0x1e5   :  { %833 = vmatpush3.bf16.msra.mxu1 %v832_v35  ;;  %v544_v43 = vmax.f32 %v499_v38, 0.0 }
 0x1e6   :  { %v503_v40 = vpop.f32.mrb[6].mxu0  ;;  %834 = vmatprep.subr.bf16.mxu1 %v880_v32 }
 0x1e7   :  { %v504_v41 = vadd.f32 %v503_v40, %v347_v39  ;;  %v778_v42 = vpop.f32.mrb[7].mxu0 }
 0x1e9   :  { %v545_v44 = vmax.f32 %v504_v41, 0.0 }
 0x1ea   :  { %v508_v45 = vpop.f32.mrb[8].mxu0 }
 0x1eb   :  { %v835_v46 = vpack.c.bf16 %v545_v44, %v544_v43  ;;  %v781_v47 = vpop.f32.mrb[9].mxu0  ;;  %v509_v49 = vadd.f32 %v508_v45, %v352_v48 }
 0x1ed   :  { %836 = vmatpush3.bf16.msra.mxu1 %v835_v46  ;;  %v546_v54 = vmax.f32 %v509_v49, 0.0 }
 0x1ee   :  { %v513_v51 = vpop.f32.mrb[10].mxu0  ;;  %837 = vmatprep.subr.bf16.mxu1 %v880_v32 }
 0x1ef   :  { %v514_v52 = vadd.f32 %v513_v51, %v357_v50  ;;  %v784_v53 = vpop.f32.mrb[11].mxu0 }
 0x1f1   :  { %v547_v55 = vmax.f32 %v514_v52, 0.0 }
 0x1f2   :  { %v518_v56 = vpop.f32.mrb[12].mxu0 }
 0x1f3   :  { %v838_v57 = vpack.c.bf16 %v547_v55, %v546_v54  ;;  %v787_v58 = vpop.f32.mrb[13].mxu0  ;;  %v519_v60 = vadd.f32 %v518_v56, %v362_v59 }
 0x1f5   :  { %839 = vmatpush3.bf16.msra.mxu1 %v838_v57  ;;  %v548_v1 = vmax.f32 %v519_v60, 0.0 }
 0x1f6   :  { %v523_v62 = vpop.f32.mrb[14].mxu0  ;;  %840 = vmatprep.subr.bf16.mxu1 %v880_v32 }
 0x1f7   :  { %v524_v63 = vadd.f32 %v523_v62, %v367_v61  ;;  %v790_v0 = vpop.f32.mrb[15].mxu0 }
 0x1f9   :  { %v549_v2 = vmax.f32 %v524_v63, 0.0 }
 0x1fa   :  { %v528_v4 = vpop.f32.mrb[16].mxu0 }
 0x1fb   :  { %v841_v5 = vpack.c.bf16 %v549_v2, %v548_v1  ;;  %v793_v6 = vpop.f32.mrb[17].mxu0  ;;  %v529_v8 = vadd.f32 %v528_v4, %v372_v7 }
 0x1fd   :  { %842 = vmatpush3.bf16.msra.mxu1 %v841_v5  ;;  %v550_v13 = vmax.f32 %v529_v8, 0.0 }
 0x1fe   :  { %v533_v10 = vpop.f32.mrb[18].mxu0  ;;  %843 = vmatprep.subr.bf16.mxu1 %v880_v32  ;;  %v560_v32 = vlaneseq }
 0x1ff   :  { %v534_v11 = vadd.f32 %v533_v10, %v377_v9  ;;  %v796_v12 = vpop.f32.mrb[19].mxu0 }
 0x200   :  { %v561_v22 = vshrl.u32 %v560_v32, 7 }
 0x201   :  { %v551_v14 = vmax.f32 %v534_v11, 0.0 }
 0x202   :  { %v538_v16 = vpop.f32.mrb[20].mxu0  ;;  %v562_v23 = vsub.s32 0, %v561_v22 }
 0x203   :  { %v844_v17 = vpack.c.bf16 %v551_v14, %v550_v13  ;;  %v539_v18 = vadd.f32 %v538_v16, %v382_v15  ;;  %v799_v19 = vpop.f32.mrb[21].mxu0 }
 0x204   :  { %v563_v25 = vrot.slane %v558_v24, %v562_v23 }
 0x205   :  { %845 = vmatpush3.bf16.msra.mxu1 %v844_v17  ;;  %v552_v20 = vmax.f32 %v539_v18, 0.0 }
 0x206   :  { %820 = vmatprep.subr.mxu1 %v877_v3 }
 0x209   :  { %821 = vmatpush3.msk.msra.mxu1 %vm568_vm7, %v552_v20 }
 0x20a   :  { %823 = vmatmul.mubr.msk.f32.vlgmr.msra.gmra.mrb[20].mxu1 %vm564_vm8, %v553_v21 }
 0x2dd   :  { %v638_v26 = vpop.f32.mrb[20].mxu1 }
 0x2de   :  { %v639_v27 = vadd.f32 %v638_v26, %v563_v25  ;;  %v824_v28 = vpop.f32.mrb[21].mxu1 }
 0x2e0   :  { %642 = vst [vmem:[#allocation3] sm:$0x1] %v639_v27 }
 0x2e1   :  { %864 = shalt.err (!%p861_p4)
}
 0x2e2   :  { %s865_s2 = scalar_lea.hbm %s1152_s9, 16 }
 0x2e3   :  { %p866_p5 = scmp.ne.s32.totalorder %s1152_s9, %s865_s2  ;;  %p869_p6 = scmp.lt.u32.totalorder %s865_s2, %s1152_s9 }
 0x2e5   :  { %p871_p7 = pnand %p869_p6, %p866_p5 }
 0x2e7   :  { %874 = shalt.err (!%p871_p7)
}
 0x2e8   :  { %652 = dma.vmem_to_hbm [thread:$0]  %s650_s4, 16, %s1152_s9, [#allocation4]  }
 0x2e9   :  { %875 = dma.done.wait [#allocation4], 16  }
 0x2ea   :  { %876 = vsyncadd [#allocation4], 4294967280 }
 0x2eb   :  { %656 = vsyncpa [#allocation4], 1 }

</bundles_post_ra>
